<compile_context>
chip_gen: v7x
topology: tpu7x:2x2x1
jax: 0.10.0
libtpu: 0.0.40
codegen_flags: <defaults>
</compile_context>

<pallas_src>
import functools

import jax
import jax.numpy as jnp
from jax.experimental import pallas as pl
from jax.experimental.pallas import tpu as pltpu


def _intersect_kernel(origin_ref, rays_ref, z_ref, *rest, near, far, has_sigma):
    if has_sigma:
        sigma_ref, zscale_ref, samples_ref, points_ref, zout_ref = rest
    else:
        sigma_ref = None
        zscale_ref, samples_ref, points_ref, zout_ref = rest

    # --- z_vals pipeline ------------------------------------------------------
    z = z_ref[...]                                    # (TB, N)
    if has_sigma:                                     # activation = identity
        z = z * (1.0 - sigma_ref[...])
    # process_z_vals: per-sample affine (z_scale.shape[-1] == 1 case); no
    # disparity / contraction with the default config.
    z = z * zscale_ref[...] + samples_ref[...]        # (1, N) broadcasts over rows

    # --- intersection ---------------------------------------------------------
    # TODO(synk): Intersect.intersect() is abstract (returns None) in the base
    # class; the identity intersection dists = z_vals is used here.
    dists = z

    # uniform_weight -> weights are constant 1, so the (weights == 0) mask term
    # is never true and weights are not computed/stored in the kernel.
    mask = (dists <= near) | (dists >= far)
    dists = jnp.where(mask, 0.0, dists)

    # --- ray origin shift + points -------------------------------------------
    ox = rays_ref[:, 0:1] - origin_ref[0]             # scalar origin from SMEM
    oy = rays_ref[:, 1:2] - origin_ref[1]
    oz = rays_ref[:, 2:3] - origin_ref[2]
    dx = rays_ref[:, 3:4]
    dy = rays_ref[:, 4:5]
    dz = rays_ref[:, 5:6]

    # points = rays_o + rays_d * dists, lane-dense over the N samples.
    points_ref[0, :, :] = ox + dx * dists
    points_ref[1, :, :] = oy + dy * dists
    points_ref[2, :, :] = oz + dz * dists

    zout_ref[...] = z


def _pick_batch_tile(B, N, n_big_streams):
    """Largest multiple-of-8 tile that divides B and keeps the double-buffered
    f32 working set ~<= 12 MiB (fits default scoped VMEM on v5e/v6e/v7x)."""
    budget = 12 * 1024 * 1024
    bytes_per_row = 2 * n_big_streams * N * 4         # double-buffered streams
    cap = max(8, budget // max(bytes_per_row, 1))
    for cand in (1024, 512, 256, 128, 64, 32, 16, 8):
        if cand <= B and cand <= cap and B % cand == 0:
            return cand
    # Remainder-free escape hatch: whole batch as one block (block == full dim).
    return B


def intersect_forward(rays, x, *, z_scale, samples, origin,
                      near=0.0, far=float("inf"), points_layout="3bn"):
    """JAX/Pallas equivalent of Intersect.forward with the default config.

    points_layout: "3bn" (default, lane-dense (3, B, N) — no extra HBM pass) or
                   "bn3" (PyTorch-compatible (B, N, 3); adds a transpose).
    """
    # TODO(synk): sort / residual_z / residual_distance / dropout / normalize /
    # non-identity contraction / ease_max weight_fn branches of the default
    # config are not taken and are not implemented here.
    B = rays.shape[0]
    z_vals = x["z_vals"].reshape(B, -1).astype(jnp.float32)
    N = z_vals.shape[1]

    sigma = x.get("sigma", None)                      # use_sigma path if present
    has_sigma = sigma is not None

    rays_f = rays.astype(jnp.float32)
    origin1d = origin.reshape(3).astype(jnp.float32)
    zscale2d = z_scale.reshape(1, N).astype(jnp.float32)
    samples2d = samples.reshape(1, N).astype(jnp.float32)

    # big (TB, N)-sized buffers per grid step: z (+ sigma) + 3 point planes + z_out
    n_big = 5 + (1 if has_sigma else 0)
    TB = _pick_batch_tile(B, N, n_big)
    grid = (B // TB,)

    kernel = functools.partial(_intersect_kernel, near=near, far=far,
                               has_sigma=has_sigma)

    in_specs = [
        pl.BlockSpec(memory_space=pltpu.MemorySpace.SMEM),   # origin: 3 scalars, no DMA stream
        pl.BlockSpec((TB, 6), lambda i: (i, 0)),             # rays
        pl.BlockSpec((TB, N), lambda i: (i, 0)),             # z_vals
    ]
    operands = [origin1d, rays_f, z_vals]
    if has_sigma:
        in_specs.append(pl.BlockSpec((TB, N), lambda i: (i, 0)))
        operands.append(sigma.reshape(B, N).astype(jnp.float32))
    in_specs += [
        pl.BlockSpec((1, N), lambda i: (0, 0)),              # z_scale (fetched once)
        pl.BlockSpec((1, N), lambda i: (0, 0)),              # samples (fetched once)
    ]
    operands += [zscale2d, samples2d]

    out_shapes = (
        jax.ShapeDtypeStruct((3, B, N), jnp.float32),        # points, lane-dense
        jax.ShapeDtypeStruct((B, N), jnp.float32),           # z
    )
    out_specs = (
        pl.BlockSpec((3, TB, N), lambda i: (0, i, 0)),
        pl.BlockSpec((TB, N), lambda i: (i, 0)),
    )

    points3, z_out = pl.pallas_call(
        kernel,
        out_shape=out_shapes,
        grid=grid,
        in_specs=in_specs,
        out_specs=out_specs,
        compiler_params=pltpu.CompilerParams(
            dimension_semantics=("parallel",)),              # 2 TCs on v7x
    )(*operands)

    # dists is a 1-op recompute of z (near/far clip); let XLA fuse it into the
    # consumer instead of paying a second (B, N) HBM write stream in the kernel.
    mask = (z_out <= near) | (z_out >= far)
    dists = jnp.where(mask, 0.0, z_out)[..., None]           # (B, N, 1)

    if points_layout == "bn3":
        points = jnp.transpose(points3, (1, 2, 0))           # PyTorch (B, N, 3)
    else:
        points = points3                                     # lane-dense (3, B, N)

    # uniform_weight -> constant ones; multiplying an existing weights tensor by
    # ones is the identity, so reuse it when shapes line up (matches the module).
    if "weights" in x and x["weights"].shape[1] == N:
        weights = x["weights"]
    else:
        weights = jnp.ones((B, N, 1), jnp.float32)

    out = dict(x)
    out["last_z"] = z_out
    out["last_distance"] = dists
    out["weights"] = weights
    out["points"] = points
    out["distances"] = dists
    out["z_vals"] = z_out
    return out


def _reference(rays, z_vals, sigma, z_scale, samples, origin, near, far):
    """Pure-JAX reference of the same forward path, for verification."""
    rays = jnp.concatenate([rays[:, :3] - origin[None], rays[:, 3:6]], -1)
    z = z_vals * (1.0 - sigma)
    z = z * z_scale[None] + samples[None]
    dists = z
    weights = jnp.ones_like(dists)
    mask = (dists <= near) | (dists >= far) | (weights == 0.0)
    dists = jnp.where(mask, 0.0, dists)
    points = rays[:, None, :3] + rays[:, None, 3:6] * dists[..., None]
    return points, dists[..., None], z, weights[..., None]


if __name__ == "__main__":
    key = jax.random.PRNGKey(0)
    B, N = 8, 128                      # 8 rays, 128 z samples per ray (z_channels = 128)

    k1, k2, k3, k4 = jax.random.split(key, 4)
    rays_o = jax.random.normal(k1, (B, 3), jnp.float32) * 0.1
    rays_d = jax.random.normal(k2, (B, 3), jnp.float32)
    rays_d = rays_d / jnp.linalg.norm(rays_d, axis=-1, keepdims=True)
    rays = jnp.concatenate([rays_o, rays_d], axis=-1)                       # (B, 6)

    z_vals = jax.random.uniform(k3, (B, N), jnp.float32, 0.0, 1.0)          # raw z predictions
    sigma = jax.random.uniform(k4, (B, N), jnp.float32, 0.0, 0.5)

    z_scale = jnp.full((N,), 0.5, jnp.float32)                              # per-sample scale
    samples = jnp.linspace(0.25, 2.0, N, dtype=jnp.float32)                 # base sample depths
    origin = jnp.array([0.1, -0.2, 0.3], jnp.float32)

    # ---- default path: no sigma, lane-dense (3, B, N) points -------------------
    out = intersect_forward(rays, {"z_vals": z_vals},
                            z_scale=z_scale, samples=samples, origin=origin,
                            near=0.0, far=float("inf"))
    jax.block_until_ready(out["points"])

    ref_pts, ref_d, ref_z, ref_w = _reference(
        rays, z_vals, jnp.zeros((B, N), jnp.float32), z_scale, samples, origin,
        0.0, float("inf"))
    assert out["points"].shape == (3, B, N)
    assert jnp.allclose(out["points"], jnp.transpose(ref_pts, (2, 0, 1)), atol=1e-5)
    assert jnp.allclose(out["distances"], ref_d, atol=1e-5)
    assert jnp.allclose(out["z_vals"], ref_z, atol=1e-5)
    assert jnp.allclose(out["weights"], ref_w, atol=1e-5)
    assert out["distances"].shape == (B, N, 1)

    # ---- sigma (use_sigma=True) path + PyTorch (B, N, 3) layout ----------------
    out2 = intersect_forward(rays, {"z_vals": z_vals, "sigma": sigma},
                             z_scale=z_scale, samples=samples, origin=origin,
                             near=0.0, far=float("inf"), points_layout="bn3")
    jax.block_until_ready(out2["points"])

    ref_pts2, ref_d2, ref_z2, ref_w2 = _reference(
        rays, z_vals, sigma, z_scale, samples, origin, 0.0, float("inf"))
    assert out2["points"].shape == (B, N, 3)
    assert jnp.allclose(out2["points"], ref_pts2, atol=1e-5)
    assert jnp.allclose(out2["distances"], ref_d2, atol=1e-5)
    assert jnp.allclose(out2["z_vals"], ref_z2, atol=1e-5)
    assert jnp.allclose(out2["weights"], ref_w2, atol=1e-5)

    print("KERNEL_OK")
</pallas_src>

<mosaic_0001>
module attributes {stable_mosaic.version = 11 : i64} {
  func.func @_intersect_kernel(%arg0: i32, %arg1: memref<3xf32, #tpu.memory_space<smem>>, %arg2: memref<8x6xf32, #tpu.memory_space<vmem>>, %arg3: memref<8x128xf32, #tpu.memory_space<vmem>>, %arg4: memref<1x128xf32, #tpu.memory_space<vmem>>, %arg5: memref<1x128xf32, #tpu.memory_space<vmem>>, %arg6: memref<3x8x128xf32, #tpu.memory_space<vmem>>, %arg7: memref<8x128xf32, #tpu.memory_space<vmem>>) attributes {dimension_semantics = [#tpu.dimension_semantics<parallel>], iteration_bounds = array<i64: 1>, scalar_prefetch = 0 : i64, scratch_operands = 0 : i64, tpu.core_type = #tpu.core_type<tc>, window_params = [{transform_indices = @transform_0, window_bounds = array<i64: 3>}, {transform_indices = @transform_1, window_bounds = array<i64: 8, 6>}, {transform_indices = @transform_2, window_bounds = array<i64: 8, 128>}, {pipeline_mode = #tpu.pipeline_mode<synchronous>, transform_indices = @transform_3, window_bounds = array<i64: 1, 128>}, {pipeline_mode = #tpu.pipeline_mode<synchronous>, transform_indices = @transform_4, window_bounds = array<i64: 1, 128>}, {transform_indices = @transform_5, window_bounds = array<i64: 3, 8, 128>}, {transform_indices = @transform_6, window_bounds = array<i64: 8, 128>}]} {
    %c0 = arith.constant 0 : index
    %c0_0 = arith.constant 0 : index
    %0 = vector.load %arg3[%c0, %c0_0] : memref<8x128xf32, #tpu.memory_space<vmem>>, vector<8x128xf32>
    %c0_1 = arith.constant 0 : index
    %c0_2 = arith.constant 0 : index
    %1 = vector.load %arg4[%c0_1, %c0_2] : memref<1x128xf32, #tpu.memory_space<vmem>>, vector<1x128xf32>
    %2 = vector.broadcast %1 : vector<1x128xf32> to vector<8x128xf32>
    %3 = arith.mulf %0, %2 : vector<8x128xf32>
    %c0_3 = arith.constant 0 : index
    %c0_4 = arith.constant 0 : index
    %4 = vector.load %arg5[%c0_3, %c0_4] : memref<1x128xf32, #tpu.memory_space<vmem>>, vector<1x128xf32>
    %5 = vector.broadcast %4 : vector<1x128xf32> to vector<8x128xf32>
    %6 = arith.addf %3, %5 : vector<8x128xf32>
    %cst = arith.constant 0.000000e+00 : f32
    %7 = vector.broadcast %cst : f32 to vector<8x128xf32>
    %8 = arith.cmpf ole, %6, %7 : vector<8x128xf32>
    %cst_5 = arith.constant 0x7F800000 : f32
    %9 = vector.broadcast %cst_5 : f32 to vector<8x128xf32>
    %10 = arith.cmpf oge, %6, %9 : vector<8x128xf32>
    %11 = arith.ori %8, %10 : vector<8x128xi1>
    %cst_6 = arith.constant 0.000000e+00 : f32
    %12 = vector.broadcast %cst_6 : f32 to vector<8x128xf32>
    %13 = arith.select %11, %12, %6 : vector<8x128xi1>, vector<8x128xf32>
    %c0_7 = arith.constant 0 : index
    %c0_8 = arith.constant 0 : index
    %14 = vector.load %arg2[%c0_7, %c0_8] : memref<8x6xf32, #tpu.memory_space<vmem>>, vector<8x1xf32>
    %c0_9 = arith.constant 0 : index
    %15 = memref.load %arg1[%c0_9] : memref<3xf32, #tpu.memory_space<smem>>
    %16 = vector.broadcast %15 : f32 to vector<8x1xf32>
    %17 = arith.subf %14, %16 : vector<8x1xf32>
    %c0_10 = arith.constant 0 : index
    %c1 = arith.constant 1 : index
    %18 = vector.load %arg2[%c0_10, %c1] : memref<8x6xf32, #tpu.memory_space<vmem>>, vector<8x1xf32>
    %c1_11 = arith.constant 1 : index
    %19 = memref.load %arg1[%c1_11] : memref<3xf32, #tpu.memory_space<smem>>
    %20 = vector.broadcast %19 : f32 to vector<8x1xf32>
    %21 = arith.subf %18, %20 : vector<8x1xf32>
    %c0_12 = arith.constant 0 : index
    %c2 = arith.constant 2 : index
    %22 = vector.load %arg2[%c0_12, %c2] : memref<8x6xf32, #tpu.memory_space<vmem>>, vector<8x1xf32>
    %c2_13 = arith.constant 2 : index
    %23 = memref.load %arg1[%c2_13] : memref<3xf32, #tpu.memory_space<smem>>
    %24 = vector.broadcast %23 : f32 to vector<8x1xf32>
    %25 = arith.subf %22, %24 : vector<8x1xf32>
    %c0_14 = arith.constant 0 : index
    %c3 = arith.constant 3 : index
    %26 = vector.load %arg2[%c0_14, %c3] : memref<8x6xf32, #tpu.memory_space<vmem>>, vector<8x1xf32>
    %c0_15 = arith.constant 0 : index
    %c4 = arith.constant 4 : index
    %27 = vector.load %arg2[%c0_15, %c4] : memref<8x6xf32, #tpu.memory_space<vmem>>, vector<8x1xf32>
    %c0_16 = arith.constant 0 : index
    %c5 = arith.constant 5 : index
    %28 = vector.load %arg2[%c0_16, %c5] : memref<8x6xf32, #tpu.memory_space<vmem>>, vector<8x1xf32>
    %29 = vector.broadcast %26 : vector<8x1xf32> to vector<8x128xf32>
    %30 = arith.mulf %29, %13 : vector<8x128xf32>
    %31 = vector.broadcast %17 : vector<8x1xf32> to vector<8x128xf32>
    %32 = arith.addf %31, %30 : vector<8x128xf32>
    %c0_17 = arith.constant 0 : index
    %c0_18 = arith.constant 0 : index
    %c0_19 = arith.constant 0 : index
    %33 = vector.load %arg6[%c0_17, %c0_18, %c0_19] : memref<3x8x128xf32, #tpu.memory_space<vmem>>, vector<1x8x128xf32>
    %34 = vector.shape_cast %33 : vector<1x8x128xf32> to vector<8x128xf32>
    %35 = vector.shape_cast %32 : vector<8x128xf32> to vector<1x8x128xf32>
    tpu.vector_store %arg6[%c0_17, %c0_18, %c0_19], %35 {strides = array<i32>} : memref<3x8x128xf32, #tpu.memory_space<vmem>>, vector<1x8x128xf32>,
    %36 = vector.broadcast %27 : vector<8x1xf32> to vector<8x128xf32>
    %37 = arith.mulf %36, %13 : vector<8x128xf32>
    %38 = vector.broadcast %21 : vector<8x1xf32> to vector<8x128xf32>
    %39 = arith.addf %38, %37 : vector<8x128xf32>
    %c1_20 = arith.constant 1 : index
    %c0_21 = arith.constant 0 : index
    %c0_22 = arith.constant 0 : index
    %40 = vector.load %arg6[%c1_20, %c0_21, %c0_22] : memref<3x8x128xf32, #tpu.memory_space<vmem>>, vector<1x8x128xf32>
    %41 = vector.shape_cast %40 : vector<1x8x128xf32> to vector<8x128xf32>
    %42 = vector.shape_cast %39 : vector<8x128xf32> to vector<1x8x128xf32>
    tpu.vector_store %arg6[%c1_20, %c0_21, %c0_22], %42 {strides = array<i32>} : memref<3x8x128xf32, #tpu.memory_space<vmem>>, vector<1x8x128xf32>,
    %43 = vector.broadcast %28 : vector<8x1xf32> to vector<8x128xf32>
    %44 = arith.mulf %43, %13 : vector<8x128xf32>
    %45 = vector.broadcast %25 : vector<8x1xf32> to vector<8x128xf32>
    %46 = arith.addf %45, %44 : vector<8x128xf32>
    %c2_23 = arith.constant 2 : index
    %c0_24 = arith.constant 0 : index
    %c0_25 = arith.constant 0 : index
    %47 = vector.load %arg6[%c2_23, %c0_24, %c0_25] : memref<3x8x128xf32, #tpu.memory_space<vmem>>, vector<1x8x128xf32>
    %48 = vector.shape_cast %47 : vector<1x8x128xf32> to vector<8x128xf32>
    %49 = vector.shape_cast %46 : vector<8x128xf32> to vector<1x8x128xf32>
    tpu.vector_store %arg6[%c2_23, %c0_24, %c0_25], %49 {strides = array<i32>} : memref<3x8x128xf32, #tpu.memory_space<vmem>>, vector<1x8x128xf32>,
    %c0_26 = arith.constant 0 : index
    %c0_27 = arith.constant 0 : index
    %50 = vector.load %arg7[%c0_26, %c0_27] : memref<8x128xf32, #tpu.memory_space<vmem>>, vector<8x128xf32>
    tpu.vector_store %arg7[%c0_26, %c0_27], %6 {strides = array<i32>} : memref<8x128xf32, #tpu.memory_space<vmem>>, vector<8x128xf32>,
    return
  }
  func.func @transform_0(%arg0: i32) -> i32 {
    %c0_i32 = arith.constant 0 : i32
    %c0_i32_0 = arith.constant 0 : i32
    return %c0_i32 : i32
  }
  func.func @transform_1(%arg0: i32) -> (i32, i32) {
    %c0_i32 = arith.constant 0 : i32
    %c0_i32_0 = arith.constant 0 : i32
    return %arg0, %c0_i32 : i32, i32
  }
  func.func @transform_2(%arg0: i32) -> (i32, i32) {
    %c0_i32 = arith.constant 0 : i32
    %c0_i32_0 = arith.constant 0 : i32
    return %arg0, %c0_i32 : i32, i32
  }
  func.func @transform_3(%arg0: i32) -> (i32, i32) {
    %c0_i32 = arith.constant 0 : i32
    %c0_i32_0 = arith.constant 0 : i32
    %c0_i32_1 = arith.constant 0 : i32
    return %c0_i32, %c0_i32_0 : i32, i32
  }
  func.func @transform_4(%arg0: i32) -> (i32, i32) {
    %c0_i32 = arith.constant 0 : i32
    %c0_i32_0 = arith.constant 0 : i32
    %c0_i32_1 = arith.constant 0 : i32
    return %c0_i32, %c0_i32_0 : i32, i32
  }
  func.func @transform_5(%arg0: i32) -> (i32, i32, i32) {
    %c0_i32 = arith.constant 0 : i32
    %c0_i32_0 = arith.constant 0 : i32
    %c0_i32_1 = arith.constant 0 : i32
    return %c0_i32, %arg0, %c0_i32_0 : i32, i32, i32
  }
  func.func @transform_6(%arg0: i32) -> (i32, i32) {
    %c0_i32 = arith.constant 0 : i32
    %c0_i32_0 = arith.constant 0 : i32
    return %arg0, %c0_i32 : i32, i32
  }
}

</mosaic_0001>

<bundles_post_ra>
// kernel: tpu_custom_call.1
= control target key start
LH: loop header
LB: loop body
LE: loop exit
PB: predicated region body
PF: predicated region fallthrough
CT: control target
= control target key end

     0   :  { %12 = vsyncpa [#allocation5], 0  ;;  %s408_s0 = inlined_call_operand.hbm [shape: f32[3], index: 0, kind: input, shape index: {}]   ;;  %s409_s1 = inlined_call_operand.hbm [shape: f32[8,6], index: 1, kind: input, shape index: {}]   ;;  %s410_s2 = inlined_call_operand.hbm [shape: f32[8,128], index: 2, kind: input, shape index: {}]   ;;  %s411_s3 = inlined_call_operand.vmem [shape: f32[1,128], index: 3, kind: input, shape index: {}]   ;;  %s412_s4 = inlined_call_operand.vmem [shape: f32[1,128], index: 4, kind: input, shape index: {}]   ;;  %s413_s5 = inlined_call_operand.hbm [shape: f32[3,8,128], index: 5, kind: output, shape index: {0}]   ;;  %s414_s6 = inlined_call_operand.hbm [shape: f32[8,128], index: 6, kind: output, shape index: {1}]  }
   0x1   :  { %13 = vsyncpa [#allocation3], 0 }
   0x2   :  { %14 = vsyncpa [#allocation8], 0 }
   0x3   :  { %15 = vsyncpa [#allocation4], 0 }
   0x4   :  { %16 = vsyncpa [#allocation11], 0  ;;  %s186_s23 = scalar_lea.hbm %s408_s0, 16 }
   0x5   :  { %p187_p0 = scmp.ne.s32.totalorder %s408_s0, %s186_s23  ;;  %p190_p1 = scmp.lt.u32.totalorder %s186_s23, %s408_s0 }
   0x7   :  { %p192_p2 = pnand %p190_p1, %p187_p0 }
   0x9   :  { %195 = shalt.err (!%p192_p2)
}
   0xa   :  { %s294_s28 = smov [#allocation2]   ;;  %s295_s7 = smov [#allocation6]  }
   0xb   :  { %24 = dma.hbm_to_smem %s408_s0, 16, %s294_s28, [#allocation5]  }
   0xc   :  { %s31_s8 = sshll.u32 %s295_s7, 4  ;;  %s296_s9 = smov [#allocation7]   ;;  %s32_s8 = int_to_ptr.vmem [resolvable:$true] %s31_s8 }
   0xd   :  { %s41_s10 = sshll.u32 %s296_s9, 4  ;;  %s196_s13 = scalar_lea.hbm %s409_s1, 128  ;;  %s42_s10 = int_to_ptr.vmem [resolvable:$true] %s41_s10 }
   0xe   :  { %p197_p3 = scmp.ne.s32.totalorder %s409_s1, %s196_s13  ;;  %p200_p4 = scmp.lt.u32.totalorder %s196_s13, %s409_s1 }
  0x10   :  { %p202_p5 = pnand %p200_p4, %p197_p3 }
  0x12   :  { %205 = shalt.err (!%p202_p5)
}
  0x13   :  { %s206_s0 = scalar_lea.vmem %s32_s8, 128  ;;  %p211_p7 = scmp.lt.s32.totalorder %s32_s8, %s32_s8 }
  0x14   :  { %p207_p6 = scmp.ne.s32.totalorder %s32_s8, %s206_s0  ;;  %p212_p8 = scmp.lt.s32.totalorder %s206_s0, %s206_s0 }
  0x16   :  { %p213_p9 = por %p212_p8, %p211_p7 }
  0x18   :  { %p214_p10 = pnand %p213_p9, %p207_p6 }
  0x1a   :  { %217 = shalt.err (!%p214_p10)
}
  0x1b   :  { %34 = dma.hbm_to_vmem [thread:$0]  %s409_s1, 128, %s32_s8, [#allocation3]  }
  0x1c   :  { %s218_s22 = scalar_lea.hbm %s410_s2, 128 }
  0x1d   :  { %p219_p11 = scmp.ne.s32.totalorder %s410_s2, %s218_s22  ;;  %p222_p12 = scmp.lt.u32.totalorder %s218_s22, %s410_s2 }
  0x1f   :  { %p224_p13 = pnand %p222_p12, %p219_p11 }
  0x21   :  { %227 = shalt.err (!%p224_p13)
}
  0x22   :  { %s228_s27 = scalar_lea.vmem %s42_s10, 128  ;;  %p233_p1 = scmp.lt.s32.totalorder %s42_s10, %s42_s10 }
  0x23   :  { %p229_p0 = scmp.ne.s32.totalorder %s42_s10, %s228_s27  ;;  %p234_p2 = scmp.lt.s32.totalorder %s228_s27, %s228_s27 }
  0x25   :  { %p235_p3 = por %p234_p2, %p233_p1 }
  0x27   :  { %p236_p4 = pnand %p235_p3, %p229_p0 }
  0x29   :  { %239 = shalt.err (!%p236_p4)
}
  0x2a   :  { %44 = dma.hbm_to_vmem [thread:$0]  %s410_s2, 128, %s42_s10, [#allocation8]  }
  0x2b   :  { %284 = dma.done.wait [#allocation5], 16  }
  0x2c   :  { %285 = vsyncadd [#allocation5], 4294967280 }
  0x2d   :  { %286 = dma.done.wait [#allocation3], 128  }
  0x2e   :  { %287 = vsyncadd [#allocation3], 4294967168 }
  0x2f   :  { %288 = dma.done.wait [#allocation8], 128  }
  0x30   :  { %289 = vsyncadd [#allocation8], 4294967168 }
  0x31   :  { %58 = sfence }
  0x32   :  { %v80_v0 = vld [vmem:[#allocation6] sm:$0xff]  ;;  %v59_v1 = vld [vmem:[#allocation7] sm:$0xff]  ;;  %v297_v2 = vmov 3   ;;  %v298_v3 = vmov 5   ;;  %s81_s29 = sld [smem:[#allocation2]]  ;;  %s166_s30 = sld [smem:[#allocation2 + $0x2]] }
  0x33   :  { %180 = vset.pattern.permute.xlu0 %v297_v2  ;;  %182 = vset.pattern.permute.xlu1 %v298_v3  ;;  %s165_s7 = sld [smem:[#allocation2 + $0x1]]  ;;  %v163_v4 = vld [vmem:[%s411_s3] ss:$0 sm:$0xff]  ;;  %v299_v8 = vmov 4   ;;  %v300_v9 = vmov 0   ;;  %v301_v15 = vmov 2  }
  0x34   :  { %92 = vperm.xlu0 %180, %v80_v0   ;;  %117 = vperm.xlu1 %182, %v80_v0   ;;  %v164_v5 = vld [vmem:[%s412_s4] ss:$0 sm:$0xff]  ;;  %v67_v6 = vmul.f32 %v163_v4, %v59_v1  ;;  %v302_v17 = vmov 1   ;;  %s303_s3 = smov [#allocation10]  }
  0x35   :  { %s148_s4 = sshll.u32 %s303_s3, 4  ;;  %s149_s4 = int_to_ptr.vmem [resolvable:$true] %s148_s4 }
  0x36   :  { %v75_v7 = vadd.f32 %v164_v5, %v67_v6  ;;  %s240_s11 = scalar_lea.vmem %s149_s4, 128  ;;  %p245_p6 = scmp.lt.s32.totalorder %s149_s4, %s149_s4 }
  0x37   :  { %p241_p5 = scmp.ne.s32.totalorder %s149_s4, %s240_s11  ;;  %p246_p7 = scmp.lt.s32.totalorder %s240_s11, %s240_s11 }
  0x38   :  { %181 = vset.pattern.permute.xlu0 %v299_v8  ;;  %183 = vset.pattern.permute.xlu1 %v300_v9  ;;  %v82_v10 = vstv %s81_s29  ;;  %v88_v11 = vstv %s166_s30  ;;  %129 = vst [vmem:[#allocation10] sm:$0xff] %v75_v7 }
  0x39   :  { %104 = vperm.xlu0 %181, %v80_v0   ;;  %v83_v12 = vsub.f32 %v80_v0, %v82_v10  ;;  %v89_v13 = vsub.f32 %v80_v0, %v88_v11  ;;  %v85_v14 = vstv %s165_s7  ;;  %p247_p8 = por %p246_p7, %p245_p6 }
  0x3a   :  { %v86_v16 = vsub.f32 %v80_v0, %v85_v14 }
  0x3b   :  { %98 = vperm.xlu1 %183, %v83_v12   ;;  %p248_p9 = pnand %p247_p8, %p241_p5 }
  0x3d   :  { %185 = vset.pattern.permute.xlu0 %v301_v15 }
  0x3e   :  { %123 = vperm.xlu0 %185, %v89_v13  }
  0x3f   :  { %184 = vset.pattern.permute.xlu1 %v302_v17 }
  0x40   :  { %110 = vperm.xlu1 %184, %v86_v16  }
  0x41   :  { %251 = shalt.err (!%p248_p9)
}
  0x42   :  { %s252_s14 = scalar_lea.hbm %s414_s6, 128 }
  0x43   :  { %p253_p10 = scmp.ne.s32.totalorder %s414_s6, %s252_s14  ;;  %p256_p11 = scmp.lt.u32.totalorder %s252_s14, %s414_s6 }
  0x45   :  { %p258_p12 = pnand %p256_p11, %p253_p10 }
  0x47   :  { %261 = shalt.err (!%p258_p12)
}
  0x48   :  { %151 = dma.vmem_to_hbm [thread:$0]  %s149_s4, 128, %s414_s6, [#allocation11]   ;;  %vm76_vm0 = vcmp.le.f32.partialorder %v75_v7, 0.0  ;;  %vm77_vm1 = vcmp.ge.f32.partialorder %v75_v7, inf }
  0x49   :  { %vm78_vm2 = vmor %vm76_vm0, %vm77_vm1  ;;  %s304_s20 = smov [#allocation9]  }
  0x4a   :  { %v79_v20 = vsel %vm78_vm2, 0.0, %v75_v7  ;;  %s135_s21 = sshll.u32 %s304_s20, 4  ;;  %s136_s21 = int_to_ptr.vmem [resolvable:$true] %s135_s21 }
  0x4b   :  { %s262_s6 = scalar_lea.vmem %s136_s21, 384  ;;  %p267_p0 = scmp.lt.s32.totalorder %s136_s21, %s136_s21 }
  0x4c   :  { %p263_p13 = scmp.ne.s32.totalorder %s136_s21, %s262_s6  ;;  %p268_p1 = scmp.lt.s32.totalorder %s262_s6, %s262_s6 }
  0x4e   :  { %p269_p2 = por %p268_p1, %p267_p0 }
  0x50   :  { %p270_p3 = pnand %p269_p2, %p263_p13 }
  0xb3   :  { %v93_v18 = vpop.permute.xlu0 %92  ;;  %v118_v19 = vpop.permute.xlu1 %117 }
  0xb4   :  { %v95_v22 = vmul.f32 %v93_v18, %v79_v20  ;;  %v120_v24 = vmul.f32 %v118_v19, %v79_v20 }
  0xb8   :  { %v105_v21 = vpop.permute.xlu0 %104 }
  0xb9   :  { %v107_v28 = vmul.f32 %v105_v21, %v79_v20 }
  0xba   :  { %v99_v23 = vpop.permute.xlu1 %98 }
  0xbb   :  { %v101_v25 = vadd.f32 %v99_v23, %v95_v22 }
  0xbd   :  { %v124_v26 = vpop.permute.xlu0 %123  ;;  %102 = vst [vmem:[#allocation9] sm:$0xff] %v101_v25 }
  0xbe   :  { %v126_v27 = vadd.f32 %v124_v26, %v120_v24 }
  0xbf   :  { %v111_v29 = vpop.permute.xlu1 %110 }
  0xc0   :  { %128 = vst [vmem:[#allocation9 + $0x10] sm:$0xff] %v126_v27  ;;  %v113_v30 = vadd.f32 %v111_v29, %v107_v28 }
  0xc2   :  { %115 = vst [vmem:[#allocation9 + $0x8] sm:$0xff] %v113_v30 }
  0xc3   :  { %273 = shalt.err (!%p270_p3)
}
  0xc4   :  { %s274_s24 = scalar_lea.hbm %s413_s5, 384 }
  0xc5   :  { %p275_p4 = scmp.ne.s32.totalorder %s413_s5, %s274_s24  ;;  %p278_p5 = scmp.lt.u32.totalorder %s274_s24, %s413_s5 }
  0xc7   :  { %p280_p6 = pnand %p278_p5, %p275_p4 }
  0xc9   :  { %283 = shalt.err (!%p280_p6)
}
  0xca   :  { %s305_s28 = smov 128   ;;  %s306_s29 = smov 8  }
  0xcb   :  { %141 = dma.vmem_to_hbm [thread:$0]  %s136_s21, 384, %s413_s5, [#allocation4], %s305_s28, %s305_s28, %s306_s29  }
  0xcc   :  { %290 = dma.done.wait [#allocation4], 384  }
  0xcd   :  { %291 = vsyncadd [#allocation4], 4294966912 }
  0xce   :  { %292 = dma.done.wait [#allocation11], 128  }
  0xcf   :  { %293 = vsyncadd [#allocation11], 4294967168 }
  0xd0   :  { %158 = vsyncpa [#allocation3], 1 }
  0xd1   :  { %159 = vsyncpa [#allocation8], 1 }
  0xd2   :  { %160 = vsyncpa [#allocation4], 1 }
  0xd3   :  { %161 = vsyncpa [#allocation11], 1 }
  0xd4   :  { %162 = vsyncpa [#allocation5], 1 }

</bundles_post_ra>
